<compile_context>
chip_gen: v7x
topology: tpu7x:2x2x1
jax: 0.10.0
libtpu: 0.0.40
codegen_flags: <defaults>
</compile_context>

<pallas_src>
import functools
import math

import jax
import jax.numpy as jnp
from jax.experimental import pallas as pl
from jax.experimental.pallas import tpu as pltpu


# ----------------------------------------------------------------------------
# Kernel 1: embedding row gather * sqrt(d_model) + positional encoding
# ----------------------------------------------------------------------------
def _embed_pe_kernel(ids_ref, table_row_ref, pe_row_ref, out_ref, *, scale):
    # ids_ref lives in SMEM and is consumed only by the BlockSpec index_maps.
    del ids_ref
    out_ref[...] = table_row_ref[...] * scale + pe_row_ref[...]


def embed_with_positional(ids, table, pe):
    """ids (B,S) int32, table (V,D) f32, pe (S,D) f32 -> (B,S,D) f32."""
    B, S = ids.shape
    V, D = table.shape
    N = B * S
    ids_flat = jnp.clip(ids.reshape(N).astype(jnp.int32), 0, V - 1)

    kernel = functools.partial(_embed_pe_kernel, scale=float(math.sqrt(D)))
    out = pl.pallas_call(
        kernel,
        out_shape=jax.ShapeDtypeStruct((N, 1, D), table.dtype),
        grid_spec=pltpu.PrefetchScalarGridSpec(
            num_scalar_prefetch=1,
            grid=(N,),
            in_specs=[
                # gathered embedding row (table stays in HBM; one row DMA/step)
                pl.BlockSpec((1, 1, D), lambda i, ids: (ids[i], 0, 0)),
                # matching positional-encoding row (token position = i % S)
                pl.BlockSpec((1, 1, D), lambda i, ids: (i % S, 0, 0)),
            ],
            out_specs=pl.BlockSpec((1, 1, D), lambda i, ids: (i, 0, 0)),
        ),
        compiler_params=pltpu.CompilerParams(
            dimension_semantics=("arbitrary",)),
    )(ids_flat, table.reshape(V, 1, D), pe.reshape(S, 1, D))
    return out.reshape(B, S, D)


# ----------------------------------------------------------------------------
# Kernel 2: one full EncoderLayer (pre-norm MHA + residual, pre-norm FFN + res)
# ----------------------------------------------------------------------------
def _encoder_layer_kernel(x_ref, mask_ref,
                          wq_ref, bq_ref, wk_ref, bk_ref, wv_ref, bv_ref,
                          wo_ref, bo_ref, w1_ref, b1_ref, w2_ref, b2_ref,
                          ln_ref, out_ref, *, n_heads, eps):
    x = x_ref[0]          # (S, D)
    mask = mask_ref[0]    # (S, S); 1.0 = attend, 0.0 = masked
    S, D = x.shape
    d_k = D // n_heads
    inv_sqrt_dk = 1.0 / math.sqrt(d_k)

    def layer_norm(y, alpha, bias):
        # torch LayerNormalization: alpha*(y-mean)/(std+eps)+bias, unbiased std
        mean = jnp.mean(y, axis=-1, keepdims=True)
        c = y - mean
        var = jnp.sum(c * c, axis=-1, keepdims=True) / (D - 1)
        return alpha * c / (jnp.sqrt(var) + eps) + bias

    # --- residual 1: x + SelfAttn(LayerNorm(x)) -----------------------------
    xn = layer_norm(x, ln_ref[0], ln_ref[1])
    q = jnp.dot(xn, wq_ref[...], preferred_element_type=jnp.float32) + bq_ref[...]
    k = jnp.dot(xn, wk_ref[...], preferred_element_type=jnp.float32) + bk_ref[...]
    v = jnp.dot(xn, wv_ref[...], preferred_element_type=jnp.float32) + bv_ref[...]

    heads = []
    for h in range(n_heads):                       # static unroll over heads
        lo = h * d_k
        qh = q[:, lo:lo + d_k]
        kh = k[:, lo:lo + d_k]
        vh = v[:, lo:lo + d_k]
        sc = jnp.dot(qh, kh.T, preferred_element_type=jnp.float32) * inv_sqrt_dk
        sc = jnp.where(mask == 0.0, jnp.float32(-1e9), sc)
        sc = sc - jnp.max(sc, axis=-1, keepdims=True)
        p = jnp.exp(sc)
        p = p / jnp.sum(p, axis=-1, keepdims=True)
        heads.append(jnp.dot(p, vh, preferred_element_type=jnp.float32))
    attn = jnp.concatenate(heads, axis=-1)         # (S, D)
    attn = jnp.dot(attn, wo_ref[...], preferred_element_type=jnp.float32) + bo_ref[...]
    x = x + attn                                   # dropout = identity (eval)

    # --- residual 2: x + FFN(LayerNorm(x)) -----------------------------------
    xn2 = layer_norm(x, ln_ref[2], ln_ref[3])
    h1 = jnp.dot(xn2, w1_ref[...], preferred_element_type=jnp.float32) + b1_ref[...]
    h1 = jnp.maximum(h1, 0.0)                      # relu
    ffn = jnp.dot(h1, w2_ref[...], preferred_element_type=jnp.float32) + b2_ref[...]
    out_ref[0] = (x + ffn).astype(out_ref.dtype)


def encoder_layer(x, mask, lp, *, n_heads, eps=1e-6):
    B, S, D = x.shape
    F = lp["w1"].shape[1]
    kernel = functools.partial(_encoder_layer_kernel, n_heads=n_heads, eps=eps)

    def full2d(r, c):
        return pl.BlockSpec((r, c), lambda b: (0, 0))

    in_specs = [
        pl.BlockSpec((1, S, D), lambda b: (b, 0, 0)),        # x
        pl.BlockSpec((1, S, S), lambda b: (b, 0, 0)),        # mask
        full2d(D, D), full2d(1, D),                          # wq, bq
        full2d(D, D), full2d(1, D),                          # wk, bk
        full2d(D, D), full2d(1, D),                          # wv, bv
        full2d(D, D), full2d(1, D),                          # wo, bo
        full2d(D, F), full2d(1, F),                          # w1, b1
        full2d(F, D), full2d(1, D),                          # w2, b2
        pl.BlockSpec(memory_space=pltpu.MemorySpace.SMEM),   # ln scalars (4,)
    ]
    return pl.pallas_call(
        kernel,
        out_shape=jax.ShapeDtypeStruct((B, S, D), x.dtype),
        grid_spec=pl.GridSpec(
            grid=(B,),
            in_specs=in_specs,
            out_specs=pl.BlockSpec((1, S, D), lambda b: (b, 0, 0)),
        ),
        compiler_params=pltpu.CompilerParams(
            dimension_semantics=("parallel",)),
    )(x, mask, lp["wq"], lp["bq"], lp["wk"], lp["bk"], lp["wv"], lp["bv"],
      lp["wo"], lp["bo"], lp["w1"], lp["b1"], lp["w2"], lp["b2"], lp["ln"])


# ----------------------------------------------------------------------------
# Kernel 3: final LayerNormalization
# ----------------------------------------------------------------------------
def _final_norm_kernel(x_ref, ln_ref, out_ref, *, eps):
    x = x_ref[0]
    D = x.shape[-1]
    mean = jnp.mean(x, axis=-1, keepdims=True)
    c = x - mean
    var = jnp.sum(c * c, axis=-1, keepdims=True) / (D - 1)
    out_ref[0] = (ln_ref[0] * c / (jnp.sqrt(var) + eps) + ln_ref[1]).astype(out_ref.dtype)


def final_layer_norm(x, ln, *, eps=1e-6):
    B, S, D = x.shape
    kernel = functools.partial(_final_norm_kernel, eps=eps)
    return pl.pallas_call(
        kernel,
        out_shape=jax.ShapeDtypeStruct((B, S, D), x.dtype),
        grid_spec=pl.GridSpec(
            grid=(B,),
            in_specs=[pl.BlockSpec((1, S, D), lambda b: (b, 0, 0)),
                      pl.BlockSpec(memory_space=pltpu.MemorySpace.SMEM)],
            out_specs=pl.BlockSpec((1, S, D), lambda b: (b, 0, 0)),
        ),
        compiler_params=pltpu.CompilerParams(
            dimension_semantics=("parallel",)),
    )(x, ln)


# ----------------------------------------------------------------------------
# Full Encoder forward (eval mode; every nn.Dropout is the identity)
# ----------------------------------------------------------------------------
def encoder_forward(ids, mask, params, *, n_heads):
    x = embed_with_positional(ids, params["table"], params["pe"])
    for lp in params["layers"]:
        x = encoder_layer(x, mask, lp, n_heads=n_heads)
    return final_layer_norm(x, params["final_ln"])


# ----------------------------------------------------------------------------
# Pure-JAX reference (mirrors the PyTorch module, eval mode)
# ----------------------------------------------------------------------------
def _ref_layer_norm(x, alpha, bias, eps=1e-6):
    mean = x.mean(axis=-1, keepdims=True)
    c = x - mean
    var = (c * c).sum(axis=-1, keepdims=True) / (x.shape[-1] - 1)
    return alpha * c / (jnp.sqrt(var) + eps) + bias


def _ref_encoder(ids, mask, params, *, n_heads):
    hp = jax.lax.Precision.HIGHEST
    table, pe = params["table"], params["pe"]
    D = table.shape[1]
    d_k = D // n_heads
    x = table[ids] * math.sqrt(D) + pe[None, :, :]
    B, S, _ = x.shape
    for lp in params["layers"]:
        xn = _ref_layer_norm(x, lp["ln"][0], lp["ln"][1])
        q = jnp.dot(xn, lp["wq"], precision=hp) + lp["bq"]
        k = jnp.dot(xn, lp["wk"], precision=hp) + lp["bk"]
        v = jnp.dot(xn, lp["wv"], precision=hp) + lp["bv"]
        qh = q.reshape(B, S, n_heads, d_k).transpose(0, 2, 1, 3)
        kh = k.reshape(B, S, n_heads, d_k).transpose(0, 2, 1, 3)
        vh = v.reshape(B, S, n_heads, d_k).transpose(0, 2, 1, 3)
        sc = jnp.einsum("bhqd,bhkd->bhqk", qh, kh, precision=hp) / math.sqrt(d_k)
        sc = jnp.where(mask[:, None, :, :] == 0.0, -1e9, sc)
        w = jax.nn.softmax(sc, axis=-1)
        a = jnp.einsum("bhqk,bhkd->bhqd", w, vh, precision=hp)
        a = a.transpose(0, 2, 1, 3).reshape(B, S, D)
        x = x + jnp.dot(a, lp["wo"], precision=hp) + lp["bo"]
        xn2 = _ref_layer_norm(x, lp["ln"][2], lp["ln"][3])
        h = jnp.maximum(jnp.dot(xn2, lp["w1"], precision=hp) + lp["b1"], 0.0)
        x = x + jnp.dot(h, lp["w2"], precision=hp) + lp["b2"]
    return _ref_layer_norm(x, params["final_ln"][0], params["final_ln"][1])


if __name__ == "__main__":
    B, S = 2, 16
    VOCAB, D_MODEL, N_HEADS, D_FF, N_LAYERS = 64, 64, 4, 128, 2

    key = jax.random.PRNGKey(0)
    key, k_ids, k_tab = jax.random.split(key, 3)
    ids = jax.random.randint(k_ids, (B, S), 0, VOCAB, dtype=jnp.int32)
    table = jax.random.normal(k_tab, (VOCAB, D_MODEL), dtype=jnp.float32) * 0.1

    # sin/cos positional-encoding buffer (same as PositionalEncoding.__init__)
    pos = jnp.arange(S, dtype=jnp.float32)[:, None]
    denom = jnp.exp(jnp.arange(0, D_MODEL, 2, dtype=jnp.float32)
                    * (-math.log(10000.0) / D_MODEL))
    pe = jnp.zeros((S, D_MODEL), jnp.float32)
    pe = pe.at[:, 0::2].set(jnp.sin(pos * denom))
    pe = pe.at[:, 1::2].set(jnp.cos(pos * denom))

    def dense(k, din, dout):
        kw, kb = jax.random.split(k)
        w = jax.random.normal(kw, (din, dout), jnp.float32) / math.sqrt(din)
        b = jax.random.normal(kb, (1, dout), jnp.float32) * 0.02
        return w, b

    layers = []
    for _ in range(N_LAYERS):
        key, *ks = jax.random.split(key, 8)
        wq, bq = dense(ks[0], D_MODEL, D_MODEL)
        wk, bk = dense(ks[1], D_MODEL, D_MODEL)
        wv, bv = dense(ks[2], D_MODEL, D_MODEL)
        wo, bo = dense(ks[3], D_MODEL, D_MODEL)
        w1, b1 = dense(ks[4], D_MODEL, D_FF)
        w2, b2 = dense(ks[5], D_FF, D_MODEL)
        ln = (jnp.array([1.0, 0.0, 1.0, 0.0], jnp.float32)
              + 0.05 * jax.random.normal(ks[6], (4,), dtype=jnp.float32))
        layers.append(dict(wq=wq, bq=bq, wk=wk, bk=bk, wv=wv, bv=bv,
                           wo=wo, bo=bo, w1=w1, b1=b1, w2=w2, b2=b2, ln=ln))

    params = dict(table=table, pe=pe, layers=layers,
                  final_ln=jnp.array([1.0, 0.0], jnp.float32))

    # padding mask: batch 0 attends everywhere, batch 1 masks the last 4 keys
    lengths = jnp.array([S, S - 4], dtype=jnp.int32)
    key_pos = jnp.arange(S)
    mask = (key_pos[None, None, :] < lengths[:, None, None]).astype(jnp.float32)
    mask = jnp.broadcast_to(mask, (B, S, S))

    out = encoder_forward(ids, mask, params, n_heads=N_HEADS)
    out = jax.block_until_ready(out)

    ref = _ref_encoder(ids, mask, params, n_heads=N_HEADS)
    assert out.shape == (B, S, D_MODEL)
    assert bool(jnp.all(jnp.isfinite(out)))
    max_err = float(jnp.max(jnp.abs(out - ref)))
    assert jnp.allclose(out, ref, atol=2e-3, rtol=2e-3), \
        f"mismatch vs JAX reference, max abs err = {max_err}"

    print("KERNEL_OK")
</pallas_src>

<mosaic_0001>
module attributes {stable_mosaic.version = 11 : i64} {
  func.func @_embed_pe_kernel(%arg0: i32, %arg1: memref<32xi32, #tpu.memory_space<smem>>, %arg2: memref<1x1x64xf32, #tpu.memory_space<vmem>>, %arg3: memref<1x1x64xf32, #tpu.memory_space<vmem>>, %arg4: memref<1x1x64xf32, #tpu.memory_space<vmem>>) attributes {dimension_semantics = [#tpu.dimension_semantics<arbitrary>], iteration_bounds = array<i64: 32>, scalar_prefetch = 1 : i64, scratch_operands = 0 : i64, tpu.core_type = #tpu.core_type<tc>, window_params = [{transform_indices = @transform_0, window_bounds = array<i64: 1, 1, 64>}, {transform_indices = @transform_1, window_bounds = array<i64: 1, 1, 64>}, {transform_indices = @transform_2, window_bounds = array<i64: 1, 1, 64>}]} {
    %c0 = arith.constant 0 : index
    %c0_0 = arith.constant 0 : index
    %c0_1 = arith.constant 0 : index
    %0 = vector.load %arg2[%c0, %c0_0, %c0_1] : memref<1x1x64xf32, #tpu.memory_space<vmem>>, vector<1x1x64xf32>
    %cst = arith.constant 8.000000e+00 : f32
    %1 = vector.broadcast %cst : f32 to vector<1x1x64xf32>
    %2 = arith.mulf %0, %1 : vector<1x1x64xf32>
    %c0_2 = arith.constant 0 : index
    %c0_3 = arith.constant 0 : index
    %c0_4 = arith.constant 0 : index
    %3 = vector.load %arg3[%c0_2, %c0_3, %c0_4] : memref<1x1x64xf32, #tpu.memory_space<vmem>>, vector<1x1x64xf32>
    %4 = arith.addf %2, %3 : vector<1x1x64xf32>
    %c0_5 = arith.constant 0 : index
    %c0_6 = arith.constant 0 : index
    %c0_7 = arith.constant 0 : index
    %5 = vector.load %arg4[%c0_5, %c0_6, %c0_7] : memref<1x1x64xf32, #tpu.memory_space<vmem>>, vector<1x1x64xf32>
    tpu.vector_store %arg4[%c0_5, %c0_6, %c0_7], %4 {strides = array<i32>} : memref<1x1x64xf32, #tpu.memory_space<vmem>>, vector<1x1x64xf32>,
    return
  }
  func.func @transform_0(%arg0: i32, %arg1: memref<32xi32, #tpu.memory_space<smem>>) -> (i32, i32, i32) {
    %0 = arith.index_cast %arg0 : i32 to index
    %1 = memref.load %arg1[%0] : memref<32xi32, #tpu.memory_space<smem>>
    %c0_i32 = arith.constant 0 : i32
    %c0_i32_0 = arith.constant 0 : i32
    %c0_i32_1 = arith.constant 0 : i32
    return %1, %c0_i32, %c0_i32_0 : i32, i32, i32
  }
  func.func @transform_1(%arg0: i32, %arg1: memref<32xi32, #tpu.memory_space<smem>>) -> (i32, i32, i32) {
    %c16_i32 = arith.constant 16 : i32
    %c0_i32 = arith.constant 0 : i32
    %0 = arith.cmpi eq, %c16_i32, %c0_i32 : i32
    %c1_i32 = arith.constant 1 : i32
    %1 = arith.select %0, %c1_i32, %c16_i32 : i32
    %2 = arith.remsi %arg0, %1 : i32
    %c0_i32_0 = arith.constant 0 : i32
    %3 = arith.cmpi ne, %2, %c0_i32_0 : i32
    %c0_i32_1 = arith.constant 0 : i32
    %4 = arith.cmpi slt, %2, %c0_i32_1 : i32
    %c0_i32_2 = arith.constant 0 : i32
    %5 = arith.cmpi slt, %1, %c0_i32_2 : i32
    %6 = arith.xori %4, %5 : i1
    %7 = arith.andi %6, %3 : i1
    %8 = arith.addi %2, %1 : i32
    %9 = arith.select %7, %8, %2 : i32
    %c0_i32_3 = arith.constant 0 : i32
    %c0_i32_4 = arith.constant 0 : i32
    %c0_i32_5 = arith.constant 0 : i32
    return %9, %c0_i32_3, %c0_i32_4 : i32, i32, i32
  }
  func.func @transform_2(%arg0: i32, %arg1: memref<32xi32, #tpu.memory_space<smem>>) -> (i32, i32, i32) {
    %c0_i32 = arith.constant 0 : i32
    %c0_i32_0 = arith.constant 0 : i32
    %c0_i32_1 = arith.constant 0 : i32
    return %arg0, %c0_i32, %c0_i32_0 : i32, i32, i32
  }
}

</mosaic_0001>

<bundles_post_ra>
// kernel: tpu_custom_call.1
= control target key start
LH: loop header
LB: loop body
LE: loop exit
PB: predicated region body
PF: predicated region fallthrough
CT: control target
= control target key end

     0   :  { %s1000_s0 = inlined_call_operand.hbm [shape: s32[32], index: 0, kind: input, shape index: {}]   ;;  %s1001_s1 = inlined_call_operand.hbm [shape: f32[64,1,64], index: 1, kind: input, shape index: {}]   ;;  %s1002_s2 = inlined_call_operand.hbm [shape: f32[16,1,64], index: 2, kind: input, shape index: {}]   ;;  %s1003_s3 = inlined_call_operand.hbm [shape: f32[32,1,64], index: 3, kind: output, shape index: {}]  }
   0x1   :  { %1011 = sst [smem:[#allocation18_spill]] %s1001_s1  ;;  %s470_s14 = scalar_lea.hbm %s1000_s0, 16 }
   0x2   :  { %p471_p0 = scmp.ne.s32.totalorder %s1000_s0, %s470_s14  ;;  %p474_p1 = scmp.lt.u32.totalorder %s470_s14, %s1000_s0 }
   0x4   :  { %p476_p2 = pnand %p474_p1, %p471_p0 }
   0x6   :  { %479 = shalt.err (!%p476_p2)  }
   0x7   :  { %s662_s19 = smov [#allocation3]  }
   0x8   :  { %9 = dma.hbm_to_smem %s1000_s0, 16, %s662_s19, [#allocation2] }
   0x9   :  { %608 = dma.done.wait [#allocation2], 16 }
   0xa   :  { %609 = vsyncadd [#allocation2], 4294967280 }
   0xb   :  { %11 = sfence }
   0xc   :  { %12 = vsyncpa [#allocation5], 0 }
   0xd   :  { %14 = vsyncpa [#allocation5 + $0x1], 0 }
   0xe   :  { %15 = vsyncpa [#allocation8], 0 }
   0xf   :  { %17 = vsyncpa [#allocation8 + $0x1], 0 }
  0x10   :  { %18 = vsyncpa [#allocation6], 0 }
  0x11   :  { %20 = vsyncpa [#allocation6 + $0x1], 0  ;;  %s698_s22 = smov 0   ;;  %s700_s23 = smov 0  }
  0x12   :  { %s702_s24 = smov 0   ;;  %s704_s25 = smov 0  }
  0x13   :  { %s706_s26 = smov 0   ;;  %s708_s0 = smov 0  }
  0x14   :  { %s710_s27 = smov 0   ;;  %s712_s28 = smov 0  }
  0x15   :  { %s714_s29 = smov 0   ;;  %s716_s30 = smov 0  }
  0x16 LB: > { %1012 = sst [smem:[#allocation16_spill]] %s656_s29  ;;  %s747_s4 = sadd.s32 4294967295, %s660_s30   ;;  %s660_s30 = sphi %s716_s30, %s1042_s30   ;;  %s656_s29 = sphi %s714_s29, %s1033_s29   ;;  %s652_s28 = sphi %s712_s28, %s1041_s28   ;;  %s648_s27 = sphi %s710_s27, %s1040_s27   ;;  %s644_s0 = sphi %s708_s0, %s1039_s0   ;;  %s640_s26 = sphi %s706_s26, %s1038_s26   ;;  %s636_s25 = sphi %s704_s25, %s1037_s25   ;;  %s632_s24 = sphi %s702_s24, %s1036_s24   ;;  %s628_s23 = sphi %s700_s23, %s1035_s23   ;;  %s624_s22 = sphi %s698_s22, %s1034_s22  }
  0x17   : > { %s348_s5 = sadd.s32 4294967294, %s660_s30   ;;  %s751_s6 = sadd.s32 1, %s660_s30  }
  0x18   : > { %s30_s7 = sld [smem:[#allocation3 + %s660_s30]]  ;;  %s35_s9 = sadd.s32 1, %s656_s29 }
  0x19   : > { %s31_s8 = sld [smem:[#allocation3 + %s751_s6]]  ;;  %p42_p3 = scmp.ne.s32.totalorder %s656_s29, %s652_s28 }
  0x1a   : > { %p1006_p4 = scmp.eq.s32.totalorder %s660_s30, 0  ;;  %p48_p5 = scmp.ne.s32.totalorder %s652_s28, %s648_s27 }
  0x1b   : > { %p1005_p6 = scmp.eq.s32.totalorder %s747_s4, 0  ;;  %s108_s11 = ssub.s32 %s660_s30, %s751_s6 }
  0x1c   : > { %p763_p7 = por %p1006_p4, %p42_p3  ;;  %p109_p9 = scmp.eq.s32.totalorder %s108_s11, 0 }
  0x1d   : > { %p771_p8 = por %p1005_p6, %p48_p5  ;;  %s111_s13 = sadd.s32 1, %s632_s24 }
  0x1e   : > { %p121_p10 = scmp.ne.s32.totalorder %s632_s24, %s628_s23  ;;  %p122_p11 = scmp.eq.s32.totalorder %s747_s4, 31 }
  0x1f   : > { %s1014_s12 = scalar_select %p771_p8, 1, 0 }
  0x20   : > { %s32_s14 = ssub.s32 %s30_s7, %s31_s8  ;;  %p127_p13 = scmp.ne.s32.totalorder %s628_s23, %s624_s22 }
  0x21   : > { %p33_p12 = scmp.eq.s32.totalorder %s32_s14, 0  ;;  %p787_p0 = por %p122_p11, %p121_p10 }
  0x22   : > { %s782_s15 = scalar_select %p109_p9, %s632_s24, %s111_s13  }
  0x23   : > { %s785_s16 = scalar_select %p33_p12, %s656_s29, %s35_s9  }
  0x24   : > { %s1016_s17 = scalar_select %p787_p0, 1, 0 }
  0x25   : > { %1015 = sst [smem:[#allocation17_spill]] %s785_s16  ;;  %p128_p1 = scmp.eq.s32.totalorder %s348_s5, 31 }
  0x26   : > { %p1004_p2 = scmp.lt.s32.totalorder %s660_s30, 32  ;;  %s148_s19 = sand.u32 1, %s656_s29  }
  0x27   : > { %p792_p3 = por %p128_p1, %p127_p13  ;;  %s151_s27 = scalar_lea.vmem [#allocation4], %s148_s19 }
  0x28   : > { %s366_s20 = scalar_select %p763_p7, [#allocation3], [#allocation10] }
  0x29   : > { %s1017_s18 = scalar_select %p792_p3, 1, 0 }
  0x2a   : > { %s367_s21 = scalar_select %p763_p7, %s660_s30, 0 }
  0x2b   : > { %s1044_s20 = smov (!%p1004_p2, %s366_s20), [#allocation11]  ;;  %s159_s7 = sshll.u32 %s151_s27, 4  ;;  %s814_s7 = int_to_ptr.vmem [resolvable:$true] %s159_s7 }
  0x2c   : > { %s1046_s21 = smov (!%p1004_p2, %s367_s21), 0  ;;  %p810_p5 = pnand %p1004_p2, %p763_p7 }
  0x2d   : > { %s152_s8 = sld [smem:[%s1044_s20 + %s1046_s21]]  ;;  %p362_p9 = scmp.ge.s32.totalorder %s660_s30, 1 }
  0x2e   : > { %p193_p10 = scmp.lt.s32.totalorder %s660_s30, 33  ;;  %s1020_s1 = sld [smem:[#allocation18_spill]] }
  0x2f   : > { %s59_s20 = ssub.s32 0, %s660_s30  ;;  %s149_s21 = scalar_lea.sflag [#allocation5], %s148_s19 }
  0x30   : > { %p818_p11 = pnand %p362_p9, %p193_p10  ;;  %p482_p13 = pneg %p810_p5 }
  0x33   : > { %s357_s11 = sshll.u32 %s152_s8, 4 }
  0x34   : > { %s826_s14 = scalar_lea.hbm %s1020_s1, %s357_s11  ;;  %s485_s13 = scalar_lea.hbm %s1020_s1, 1024 }
  0x35   : > { %s480_s27 = scalar_lea.hbm %s826_s14, 16  ;;  %p486_p10 = scmp.lt.u32.totalorder %s826_s14, %s1020_s1 }
  0x36   : > { %p481_p7 = scmp.ne.s32.totalorder %s826_s14, %s480_s27  ;;  %p487_p2 = scmp.lt.u32.totalorder %s485_s13, %s480_s27 }
  0x37   : > { %p489_p4 = scmp.lt.u32.totalorder %s480_s27, %s826_s14 }
  0x38   : > { %p483_p1 = pnand %p482_p13, %p481_p7  ;;  %p488_p6 = por %p487_p2, %p486_p10 }
  0x3a   : > { %p484_p9 = pneg %p483_p1  ;;  %p490_p12 = por %p489_p4, %p488_p6 }
  0x3c   : > { %p491_p3 = pnand %p490_p12, %p484_p9 }
  0x3e   : > { %494 = shalt.err (!%p491_p3)
}
  0x3f   : > { %s495_s19 = scalar_lea.vmem %s814_s7, 16  ;;  %s663_s16 = smov [#allocation4]  }
  0x40   : > { %p496_p7 = scmp.ne.s32.totalorder %s814_s7, %s495_s19  ;;  %s500_s8 = sshll.u32 %s663_s16, 4  ;;  %s501_s8 = int_to_ptr.vmem [resolvable:$false] %s500_s8 }
  0x41   : > { %s502_s11 = scalar_lea.vmem %s501_s8, 32  ;;  %p503_p8 = scmp.lt.s32.totalorder %s814_s7, %s501_s8 }
  0x42   : > { %p498_p1 = pnand %p496_p7, %p482_p13  ;;  %p504_p2 = scmp.lt.s32.totalorder %s502_s11, %s495_s19 }
  0x44   : > { %p499_p0 = pneg %p498_p1  ;;  %p505_p10 = por %p504_p2, %p503_p8 }
  0x46   : > { %p506_p4 = pnand %p505_p10, %p499_p0 }
  0x48   : > { %509 = shalt.err (!%p506_p4)
}
  0x49   : > { %379 = dma.hbm_to_vmem [thread:$0]  (!%p810_p5), %s826_s14, 16, %s814_s7, %s149_s21  }
  0x4a   : > { %s349_s27 = smin.u32 %s660_s30, %s59_s20  ;;  %p70_p6 = scmp.lt.s32.totalorder %s751_s6, 0 }
  0x4b   : > { %s61_s13 = sand.u32 15, %s349_s27   ;;  %s71_s5 = ssub.s32 0, %s751_s6 }
  0x4c   : > { %s62_s10 = ssub.s32 0, %s61_s13  ;;  %s352_s19 = smin.u32 %s71_s5, %s751_s6 }
  0x4d   : > { %p1021_p8 = scmp.lt.s32.totalorder %s660_s30, 0  ;;  %s73_s16 = sand.u32 15, %s352_s19  }
  0x4e   : > { %s85_s8 = sadd.s32 1, %s644_s0  ;;  %s74_s1 = ssub.s32 0, %s73_s16 }
  0x4f   : > { %s1048_s10 = smov (!%p1021_p8, %s62_s10), %s61_s13  ;;  %p92_p3 = scmp.ne.s32.totalorder %s644_s0, %s640_s26 }
  0x50   : > { %p351_p0 = scmp.lt.s32.totalorder %s1048_s10, 0  ;;  %s68_s11 = sadd.s32 16, %s1048_s10 }
  0x51   : > { %s1052_s1 = smov (!%p70_p6, %s74_s1), %s73_s16  ;;  %p1022_p5 = scmp.eq.s32.totalorder %s660_s30, 0 }
  0x52   : > { %s1050_s11 = smov (!%p351_p0, %s68_s11), %s1048_s10  ;;  %p98_p13 = scmp.ne.s32.totalorder %s640_s26, %s636_s25 }
  0x53   : > { %p867_p12 = por %p92_p3, %p1022_p5  ;;  %p354_p9 = scmp.lt.s32.totalorder %s1052_s1, 0 }
  0x54   : > { %s80_s14 = sadd.s32 16, %s1052_s1  ;;  %p1024_p7 = scmp.eq.s32.totalorder %s747_s4, 0 }
  0x55   : > { %s166_s21 = sand.u32 1, %s644_s0   ;;  %s1054_s14 = smov (!%p354_p9, %s80_s14), %s1052_s1 }
  0x56   : > { %p875_p1 = por %p98_p13, %p1024_p7  ;;  %s82_s27 = ssub.s32 %s1050_s11, %s1054_s14 }
  0x57   : > { %s361_s13 = sshll.u32 %s1050_s11, 4  ;;  %p83_p2 = scmp.eq.s32.totalorder %s82_s27, 0 }
  0x58   : > { %s1025_s20 = scalar_select %p875_p1, 1, 0 }
  0x59   : > { %s883_s19 = scalar_lea.hbm %s1002_s2, %s361_s13  ;;  %s169_s25 = scalar_lea.vmem [#allocation7], %s166_s21 }
  0x5a   : > { %s188_s16 = sshll.u32 %s169_s25, 4  ;;  %p1026_p10 = scmp.lt.s32.totalorder %s660_s30, 32  ;;  %s896_s16 = int_to_ptr.vmem [resolvable:$true] %s188_s16 }
  0x5b   : > { %s894_s1 = scalar_select %p83_p2, %s644_s0, %s85_s8  }
  0x5c   : > { %p889_p4 = pnand %p1026_p10, %p867_p12  ;;  %s167_s11 = scalar_lea.sflag [#allocation8], %s166_s21 }
  0x5d   : > { %s510_s14 = scalar_lea.hbm %s883_s19, 16  ;;  %s515_s13 = scalar_lea.hbm %s1002_s2, 256 }
  0x5e   : > { %p511_p6 = scmp.ne.s32.totalorder %s883_s19, %s510_s14  ;;  %p512_p8 = pneg %p889_p4 }
  0x5f   : > { %p516_p5 = scmp.lt.u32.totalorder %s883_s19, %s1002_s2  ;;  %p517_p12 = scmp.lt.u32.totalorder %s515_s13, %s510_s14 }
  0x60   : > { %p513_p0 = pnand %p512_p8, %p511_p6  ;;  %p519_p9 = scmp.lt.u32.totalorder %s510_s14, %s883_s19 }
  0x61   : > { %p518_p13 = por %p517_p12, %p516_p5 }
  0x62   : > { %p514_p3 = pneg %p513_p0 }
  0x63   : > { %p520_p7 = por %p519_p9, %p518_p13 }
  0x65   : > { %p521_p2 = pnand %p520_p7, %p514_p3 }
  0x67   : > { %524 = shalt.err (!%p521_p2)
}
  0x68   : > { %s525_s8 = scalar_lea.vmem %s896_s16, 16  ;;  %s664_s21 = smov [#allocation7]  }
  0x69   : > { %p526_p10 = scmp.ne.s32.totalorder %s896_s16, %s525_s8  ;;  %s530_s25 = sshll.u32 %s664_s21, 4  ;;  %s531_s25 = int_to_ptr.vmem [resolvable:$false] %s530_s25 }
  0x6a   : > { %s532_s7 = scalar_lea.vmem %s531_s25, 32  ;;  %p533_p1 = scmp.lt.s32.totalorder %s896_s16, %s531_s25 }
  0x6b   : > { %p528_p6 = pnand %p526_p10, %p512_p8  ;;  %p534_p5 = scmp.lt.s32.totalorder %s532_s7, %s525_s8 }
  0x6d   : > { %p529_p0 = pneg %p528_p6  ;;  %p535_p12 = por %p534_p5, %p533_p1 }
  0x6f   : > { %p536_p13 = pnand %p535_p12, %p529_p0 }
  0x71   : > { %539 = shalt.err (!%p536_p13)
}
  0x72   : > { %382 = dma.hbm_to_vmem [thread:$0]  (!%p889_p4), %s883_s19, 16, %s896_s16, %s167_s11  }
  0x73   : > { %197 = sbr.rel (%p818_p11) target bundleno = 152 (0x98), region = 28  ;;  %s199_s14 = sand.u32 (!%p818_p11), 1, %s652_s28  }
  0x74   : > { %s200_s27 = scalar_lea.sflag (!%p818_p11), [#allocation5], %s199_s14  ;;  %s202_s13 = scalar_lea.vmem (!%p818_p11), [#allocation4], %s199_s14 }
  0x75   : > { %p1028_p8 = scmp.ne.s32.totalorder (!%p818_p11), %s1014_s12, 0 }
  0x7a   : > { %611 = dma.done.wait (%p1028_p8), %s200_s27, 16  }
  0x7b   : > { %613 = vsyncadd (%p1028_p8), %s200_s27, 4294967280  ;;  %s207_s5 = sand.u32 1, %s640_s26   ;;  %p1029_p1 = scmp.ne.s32.totalorder %s1025_s20, 0 }
  0x7c   : > { %s208_s29 = scalar_lea.sflag [#allocation8], %s207_s5  ;;  %s210_s10 = scalar_lea.vmem [#allocation7], %s207_s5 }
  0x7d   : > { %615 = dma.done.wait (%p1029_p1), %s208_s29, 16  }
  0x7e   : > { %617 = vsyncadd (%p1029_p1), %s208_s29, 4294967280  ;;  %s231_s9 = sand.u32 1, %s628_s23   ;;  %v246_v0 = vld [vmem:[%s202_s13] sm:$0x1]  ;;  %s363_s12 = sshll.u32 %s747_s4, 4  ;;  %vm250_vm0 = vcmask 516096  }
  0x7f   : > { %v248_v1 = vld [vmem:[%s210_s10] sm:$0x1]  ;;  %s232_s19 = scalar_lea.vmem [#allocation9], %s231_s9  ;;  %v247_v2 = vmul.f32 8.0, %v246_v0  ;;  %s942_s20 = scalar_lea.hbm %s1003_s3, %s363_s12 }
  0x80   : > { %s265_s16 = sshll.u32 %s232_s19, 4  ;;  %s253_s21 = scalar_lea.sflag [#allocation6], %s231_s9  ;;  %s937_s16 = int_to_ptr.vmem [resolvable:$true] %s265_s16 }
  0x81   : > { %v249_v3 = vadd.f32 %v248_v1, %v247_v2  ;;  %s540_s25 = scalar_lea.vmem %s937_s16, 16  ;;  %p1030_p4 = scmp.ne.s32.totalorder %s1016_s17, 0 }
  0x82   : > { %p541_p11 = scmp.ne.s32.totalorder %s937_s16, %s540_s25  ;;  %s665_s4 = smov [#allocation9]  }
  0x83   : > { %251 = vst.msk [vmem:[%s232_s19] sm:$0x1] %vm250_vm0, %v249_v3  ;;  %s544_s7 = sshll.u32 %s665_s4, 4  ;;  %s545_s7 = int_to_ptr.vmem [resolvable:$false] %s544_s7 }
  0x84   : > { %p542_p3 = pnand %p541_p11, %p1030_p4  ;;  %s546_s14 = scalar_lea.vmem %s545_s7, 32 }
  0x85   : > { %p547_p7 = scmp.lt.s32.totalorder %s937_s16, %s545_s7  ;;  %p548_p2 = scmp.lt.s32.totalorder %s546_s14, %s540_s25 }
  0x86   : > { %p543_p9 = pneg %p542_p3 }
  0x87   : > { %p549_p10 = por %p548_p2, %p547_p7 }
  0x89   : > { %p550_p6 = pnand %p549_p10, %p543_p9 }
  0x8b   : > { %553 = shalt.err (!%p550_p6)
}
  0x8c   : > { %s554_s27 = scalar_lea.hbm %s942_s20, 16  ;;  %s558_s29 = scalar_lea.hbm %s1003_s3, 512 }
  0x8d   : > { %p555_p0 = scmp.ne.s32.totalorder %s942_s20, %s554_s27  ;;  %p559_p13 = scmp.lt.u32.totalorder %s942_s20, %s1003_s3 }
  0x8e   : > { %p560_p8 = scmp.lt.u32.totalorder %s558_s29, %s554_s27  ;;  %p562_p11 = scmp.lt.u32.totalorder %s554_s27, %s942_s20 }
  0x8f   : > { %p556_p5 = pnand %p555_p0, %p1030_p4 }
  0x90   : > { %p561_p1 = por %p560_p8, %p559_p13 }
  0x91   : > { %p557_p12 = pneg %p556_p5 }
  0x92   : > { %p563_p3 = por %p562_p11, %p561_p1 }
  0x94   : > { %p564_p9 = pnand %p563_p3, %p557_p12 }
  0x96   : > { %567 = shalt.err (!%p564_p9)
}
  0x97   : > { %372 = dma.vmem_to_hbm [thread:$0]  (%p1030_p4), %s937_s16, 16, %s942_s20, %s253_s21  }
  0x98 PF: > { %p388_p7 = scmp.ge.s32.totalorder %s660_s30, 2  ;;  %s277_s19 = sand.u32 1, %s624_s22  }
  0x99   : > { %p1031_p2 = scmp.ne.s32.totalorder %s1017_s18, 0  ;;  %s278_s12 = scalar_lea.sflag [#allocation6], %s277_s19 }
  0x9b   : > { %p384_p10 = pnand %p388_p7, %p1031_p2 }
  0x9d   : > { %619 = dma.done.wait (!%p384_p10), %s278_s12, 16  }
  0x9e   : > { %621 = vsyncadd (!%p384_p10), %s278_s12, 4294967280  ;;  %s1032_s17 = sld [smem:[#allocation16_spill]]  ;;  %s1033_s29 = sld [smem:[#allocation17_spill]] }
  0x9f   : > { %p23_p4 = scmp.ge.s32.totalorder %s751_s6, 34   ;;  %s1034_s22 = smov %s628_s23 }
  0xa0   : > { %s1035_s23 = smov %s632_s24  ;;  %s1036_s24 = smov %s782_s15 }
  0xa1   : > { %s1037_s25 = smov %s640_s26  ;;  %s1038_s26 = smov %s644_s0 }
  0xa2   : > { %s1039_s0 = smov %s894_s1  ;;  %s1040_s27 = smov %s652_s28 }
  0xa3   : > { %s1042_s30 = smov %s751_s6  ;;  %25 = sbr.rel (!%p23_p4) target bundleno = 22 (0x16), region = 86 }
  0xa4   : > { %s1041_s28 = smov %s1032_s17 }
  0xaa   :  { %282 = vsyncpa [#allocation5], 1 }
  0xab   :  { %284 = vsyncpa [#allocation5 + $0x1], 1 }
  0xac   :  { %285 = vsyncpa [#allocation8], 1 }
  0xad   :  { %287 = vsyncpa [#allocation8 + $0x1], 1 }
  0xae   :  { %288 = vsyncpa [#allocation6], 1 }
  0xaf   :  { %290 = vsyncpa [#allocation6 + $0x1], 1 }

</bundles_post_ra>
